<compile_context>
chip_gen: v7x
topology: tpu7x:2x2x1
jax: 0.10.0
libtpu: 0.0.40
codegen_flags: <defaults>
</compile_context>

<pallas_src>
import functools

import jax
import jax.numpy as jnp
from jax.experimental import pallas as pl
from jax.experimental.pallas import tpu as pltpu


def _round_up(x: int, m: int) -> int:
    return ((x + m - 1) // m) * m


def _round_down(x: int, m: int) -> int:
    return (x // m) * m


def _netlin_vpu_kernel(w_ref, x_ref, o_ref, *, c_in: int, c_out: int):
    """Tiny-channel path: SMEM scalar weights + VPU FMA over C_in rows.

    w_ref: SMEM [C_out, C_in] (f32 scalars)
    x_ref: VMEM [b_blk, C_in, tile]
    o_ref: VMEM [b_blk, C_out, tile]
    """
    outs = []
    for co in range(c_out):
        # Per-row read + cast inside the FMA chain (no whole-tile f32 copy).
        acc = w_ref[co, 0] * x_ref[:, 0:1, :].astype(jnp.float32)
        for ci in range(1, c_in):
            acc = acc + w_ref[co, ci] * x_ref[:, ci:ci + 1, :].astype(jnp.float32)
        outs.append(acc)                                   # [b_blk, 1, tile]
    out = outs[0] if c_out == 1 else jnp.concatenate(outs, axis=1)
    o_ref[...] = out.astype(o_ref.dtype)                   # single unmasked store


def _netlin_mxu_kernel(x_ref, w_ref, o_ref, *, b_blk: int):
    """General path: weight-as-LHS matmul on the MXU, spatial dim on lanes.

    x_ref: VMEM [b_blk, C_in, tile]
    w_ref: VMEM [C_out, C_in]
    o_ref: VMEM [b_blk, C_out, tile]
    """
    w = w_ref[...]
    for bi in range(b_blk):        # b_blk is small (capped) on this path
        o_ref[bi] = jnp.dot(
            w, x_ref[bi], preferred_element_type=jnp.float32
        ).astype(o_ref.dtype)


def _choose_tiling(b, c_in, c_out, m_total, itemsize, budget_bytes, max_b_blk):
    """Pick (b_blk, tile) so one grid step moves ~budget_bytes of x+out."""
    m128 = _round_up(m_total, 128)
    row_bytes = (c_in + c_out) * itemsize          # bytes per spatial element (x + out)
    tile = min(m128, max(128, _round_down(budget_bytes // max(row_bytes, 1), 128)))
    if tile < m128:
        return 1, tile
    # Whole spatial extent fits in one tile -> pack batches to fill the budget.
    per_batch = row_bytes * m128
    b_blk = int(min(max_b_blk, max(1, budget_bytes // max(per_batch, 1))))
    return b_blk, m128


def netlin_layer(x_nchw: jax.Array, weight: jax.Array, *,
                 block_budget_bytes: int = 3 << 20,
                 vpu_max_chn: int = 16) -> jax.Array:
    """1x1 conv with no bias (NetLinLayer.forward, eval mode).

    Args:
      x_nchw: [B, C_in, H, W] input (NCHW, PyTorch convention).
      weight: [C_out, C_in] or [C_out, C_in, 1, 1] Conv2d weight.

    Returns:
      [B, C_out, H, W] output (NCHW), same dtype as x.
    """
    if weight.ndim == 4:
        weight = weight.reshape(weight.shape[0], weight.shape[1])
    b, c_in, h, w = x_nchw.shape
    c_out = weight.shape[0]
    m_total = h * w
    itemsize = jnp.dtype(x_nchw.dtype).itemsize

    use_vpu = (c_in <= vpu_max_chn) and (c_out <= 8)
    # VPU path vectorizes over the batch block; MXU path unrolls it -> cap there.
    max_b_blk = b if use_vpu else min(b, 8)
    b_blk, tile = _choose_tiling(b, c_in, c_out, m_total, itemsize,
                                 block_budget_bytes, max_b_blk)

    grid = (pl.cdiv(b, b_blk), pl.cdiv(m_total, tile))

    # Free reshape — stays in NCHW-native memory order, no transpose, no pad.
    x3 = x_nchw.reshape(b, c_in, m_total)

    x_spec = pl.BlockSpec((b_blk, c_in, tile), lambda bi, mi: (bi, 0, mi))
    o_spec = pl.BlockSpec((b_blk, c_out, tile), lambda bi, mi: (bi, 0, mi))

    if use_vpu:
        kernel = functools.partial(_netlin_vpu_kernel, c_in=c_in, c_out=c_out)
        in_specs = [
            pl.BlockSpec(memory_space=pltpu.MemorySpace.SMEM),   # weight scalars
            x_spec,
        ]
        args = (weight.astype(jnp.float32), x3)
    else:
        kernel = functools.partial(_netlin_mxu_kernel, b_blk=b_blk)
        in_specs = [
            x_spec,
            pl.BlockSpec((c_out, c_in), lambda bi, mi: (0, 0)),  # full weight
        ]
        args = (x3, weight.astype(x_nchw.dtype))

    # Mem-bound cost hint so XLA overlaps neighbors with this kernel.
    cost = pl.CostEstimate(
        flops=2 * b * c_out * c_in * m_total,
        transcendentals=0,
        bytes_accessed=(b * (c_in + c_out) * m_total) * itemsize
        + weight.size * itemsize,
    )

    # Only raise the scoped-VMEM limit if the live blocks would not fit the
    # smallest default (v5e: 16 MiB); typical shapes stay on defaults.
    x_blk_bytes = b_blk * c_in * tile * itemsize
    o_blk_bytes = b_blk * c_out * tile * itemsize
    est_live = 2 * (x_blk_bytes + o_blk_bytes) + weight.size * 4
    cp_kwargs = dict(dimension_semantics=("parallel", "parallel"))
    if est_live > (12 << 20):
        cp_kwargs["vmem_limit_bytes"] = int(min(2 * est_live, 48 << 20))

    out3 = pl.pallas_call(
        kernel,
        out_shape=jax.ShapeDtypeStruct((b, c_out, m_total), x_nchw.dtype),
        grid=grid,
        in_specs=in_specs,
        out_specs=o_spec,
        compiler_params=pltpu.CompilerParams(**cp_kwargs),
        cost_estimate=cost,
    )(*args)

    return out3.reshape(b, c_out, h, w)


if __name__ == "__main__":
    # Module config: chn_in=4, chn_out=1, use_dropout=False (eval -> identity).
    B, C_IN, C_OUT, H, W = 2, 4, 1, 16, 16

    key = jax.random.PRNGKey(0)
    kx, kw = jax.random.split(key)
    x = jax.random.normal(kx, (B, C_IN, H, W), dtype=jnp.float32)
    weight = jax.random.normal(kw, (C_OUT, C_IN), dtype=jnp.float32) * 0.1

    out = netlin_layer(x, weight)
    jax.block_until_ready(out)
    ref = jnp.einsum("bchw,oc->bohw", x, weight)
    assert out.shape == (B, C_OUT, H, W), out.shape
    assert jnp.allclose(out, ref, atol=1e-5, rtol=1e-5)

    # Check 2: non-128-multiple spatial extent on the VPU path — exercises
    # ragged last-tile OOB reads (padded) and dropped OOB writes, no host pad.
    k1x, k1w = jax.random.split(jax.random.PRNGKey(1))
    x1 = jax.random.normal(k1x, (2, 4, 13, 10), dtype=jnp.float32)
    w1 = jax.random.normal(k1w, (1, 4), dtype=jnp.float32) * 0.1
    out1 = netlin_layer(x1, w1)
    jax.block_until_ready(out1)
    ref1 = jnp.einsum("bchw,oc->bohw", x1, w1)
    assert out1.shape == ref1.shape, out1.shape
    assert jnp.allclose(out1, ref1, atol=1e-5, rtol=1e-5)

    # Check 3: realistic channel count -> MXU weight-as-LHS path, ragged spatial.
    k2x, k2w = jax.random.split(jax.random.PRNGKey(2))
    x2 = jax.random.normal(k2x, (2, 64, 12, 10), dtype=jnp.float32)
    w2 = jax.random.normal(k2w, (1, 64), dtype=jnp.float32) * 0.05
    out2 = netlin_layer(x2, w2)
    jax.block_until_ready(out2)
    ref2 = jnp.einsum("bchw,oc->bohw", x2, w2)
    assert out2.shape == ref2.shape, out2.shape
    assert jnp.allclose(out2, ref2, atol=1e-4, rtol=1e-4)

    # Check 4: tiny block budget forces a multi-step pipelined grid with a
    # ragged final spatial tile (MXU path, c_out > 1).
    k3x, k3w = jax.random.split(jax.random.PRNGKey(3))
    x3 = jax.random.normal(k3x, (3, 64, 33, 40), dtype=jnp.float32)
    w3 = jax.random.normal(k3w, (2, 64), dtype=jnp.float32) * 0.05
    out3 = netlin_layer(x3, w3, block_budget_bytes=64 << 10)
    jax.block_until_ready(out3)
    ref3 = jnp.einsum("bchw,oc->bohw", x3, w3)
    assert out3.shape == ref3.shape, out3.shape
    assert jnp.allclose(out3, ref3, atol=1e-4, rtol=1e-4)

    print("KERNEL_OK")
</pallas_src>

<mosaic_0001>
module attributes {stable_mosaic.version = 11 : i64} {
  func.func @_netlin_vpu_kernel(%arg0: i32, %arg1: i32, %arg2: memref<1x4xf32, #tpu.memory_space<smem>>, %arg3: memref<2x4x256xf32, #tpu.memory_space<vmem>>, %arg4: memref<2x1x256xf32, #tpu.memory_space<vmem>>) attributes {dimension_semantics = [#tpu.dimension_semantics<parallel>, #tpu.dimension_semantics<parallel>], iteration_bounds = array<i64: 1, 1>, scalar_prefetch = 0 : i64, scratch_operands = 0 : i64, tpu.core_type = #tpu.core_type<tc>, window_params = [{transform_indices = @transform_0, window_bounds = array<i64: 1, 4>}, {transform_indices = @transform_1, window_bounds = array<i64: 2, 4, 256>}, {transform_indices = @transform_2, window_bounds = array<i64: 2, 1, 256>}]} {
    %c0 = arith.constant 0 : index
    %c0_0 = arith.constant 0 : index
    %0 = memref.load %arg2[%c0, %c0_0] : memref<1x4xf32, #tpu.memory_space<smem>>
    %c0_1 = arith.constant 0 : index
    %c0_2 = arith.constant 0 : index
    %c0_3 = arith.constant 0 : index
    %1 = vector.load %arg3[%c0_1, %c0_2, %c0_3] : memref<2x4x256xf32, #tpu.memory_space<vmem>>, vector<2x1x256xf32>
    %2 = vector.broadcast %0 : f32 to vector<2x1x256xf32>
    %3 = arith.mulf %2, %1 : vector<2x1x256xf32>
    %c0_4 = arith.constant 0 : index
    %c1 = arith.constant 1 : index
    %4 = memref.load %arg2[%c0_4, %c1] : memref<1x4xf32, #tpu.memory_space<smem>>
    %c0_5 = arith.constant 0 : index
    %c1_6 = arith.constant 1 : index
    %c0_7 = arith.constant 0 : index
    %5 = vector.load %arg3[%c0_5, %c1_6, %c0_7] : memref<2x4x256xf32, #tpu.memory_space<vmem>>, vector<2x1x256xf32>
    %6 = vector.broadcast %4 : f32 to vector<2x1x256xf32>
    %7 = arith.mulf %6, %5 : vector<2x1x256xf32>
    %8 = arith.addf %3, %7 : vector<2x1x256xf32>
    %c0_8 = arith.constant 0 : index
    %c2 = arith.constant 2 : index
    %9 = memref.load %arg2[%c0_8, %c2] : memref<1x4xf32, #tpu.memory_space<smem>>
    %c0_9 = arith.constant 0 : index
    %c2_10 = arith.constant 2 : index
    %c0_11 = arith.constant 0 : index
    %10 = vector.load %arg3[%c0_9, %c2_10, %c0_11] : memref<2x4x256xf32, #tpu.memory_space<vmem>>, vector<2x1x256xf32>
    %11 = vector.broadcast %9 : f32 to vector<2x1x256xf32>
    %12 = arith.mulf %11, %10 : vector<2x1x256xf32>
    %13 = arith.addf %8, %12 : vector<2x1x256xf32>
    %c0_12 = arith.constant 0 : index
    %c3 = arith.constant 3 : index
    %14 = memref.load %arg2[%c0_12, %c3] : memref<1x4xf32, #tpu.memory_space<smem>>
    %c0_13 = arith.constant 0 : index
    %c3_14 = arith.constant 3 : index
    %c0_15 = arith.constant 0 : index
    %15 = vector.load %arg3[%c0_13, %c3_14, %c0_15] : memref<2x4x256xf32, #tpu.memory_space<vmem>>, vector<2x1x256xf32>
    %16 = vector.broadcast %14 : f32 to vector<2x1x256xf32>
    %17 = arith.mulf %16, %15 : vector<2x1x256xf32>
    %18 = arith.addf %13, %17 : vector<2x1x256xf32>
    %c0_16 = arith.constant 0 : index
    %c0_17 = arith.constant 0 : index
    %c0_18 = arith.constant 0 : index
    %19 = vector.load %arg4[%c0_16, %c0_17, %c0_18] : memref<2x1x256xf32, #tpu.memory_space<vmem>>, vector<2x1x256xf32>
    tpu.vector_store %arg4[%c0_16, %c0_17, %c0_18], %18 {strides = array<i32>} : memref<2x1x256xf32, #tpu.memory_space<vmem>>, vector<2x1x256xf32>,
    return
  }
  func.func @transform_0(%arg0: i32, %arg1: i32) -> (i32, i32) {
    %c0_i32 = arith.constant 0 : i32
    %c0_i32_0 = arith.constant 0 : i32
    %c0_i32_1 = arith.constant 0 : i32
    return %c0_i32, %c0_i32_0 : i32, i32
  }
  func.func @transform_1(%arg0: i32, %arg1: i32) -> (i32, i32, i32) {
    %c0_i32 = arith.constant 0 : i32
    %c0_i32_0 = arith.constant 0 : i32
    return %arg0, %c0_i32, %arg1 : i32, i32, i32
  }
  func.func @transform_2(%arg0: i32, %arg1: i32) -> (i32, i32, i32) {
    %c0_i32 = arith.constant 0 : i32
    %c0_i32_0 = arith.constant 0 : i32
    return %arg0, %c0_i32, %arg1 : i32, i32, i32
  }
}

</mosaic_0001>

<bundles_post_ra>
// kernel: tpu_custom_call.1
= control target key start
LH: loop header
LB: loop body
LE: loop exit
PB: predicated region body
PF: predicated region fallthrough
CT: control target
= control target key end

     0   :  { %7 = vsyncpa [#allocation5], 0  ;;  %s226_s0 = inlined_call_operand.hbm [shape: f32[1,4], index: 0, kind: input, shape index: {}]   ;;  %s227_s1 = inlined_call_operand.hbm [shape: f32[2,4,256], index: 1, kind: input, shape index: {}]   ;;  %s228_s2 = inlined_call_operand.hbm [shape: f32[2,1,256], index: 2, kind: output, shape index: {}]  }
   0x1   :  { %8 = vsyncpa [#allocation3], 0 }
   0x2   :  { %9 = vsyncpa [#allocation4], 0  ;;  %s108_s11 = scalar_lea.hbm %s226_s0, 16 }
   0x3   :  { %p109_p0 = scmp.ne.s32.totalorder %s226_s0, %s108_s11  ;;  %p112_p1 = scmp.lt.u32.totalorder %s108_s11, %s226_s0 }
   0x5   :  { %p114_p2 = pnand %p112_p1, %p109_p0 }
   0x7   :  { %117 = shalt.err (!%p114_p2)
}
   0x8   :  { %s168_s16 = smov [#allocation2]   ;;  %s169_s19 = smov [#allocation6]  }
   0x9   :  { %17 = dma.hbm_to_smem %s226_s0, 16, %s168_s16, [#allocation5]  }
   0xa   :  { %s23_s20 = sshll.u32 %s169_s19, 4  ;;  %s118_s23 = scalar_lea.hbm %s227_s1, 256  ;;  %s24_s20 = int_to_ptr.vmem [resolvable:$true] %s23_s20 }
   0xb   :  { %p119_p3 = scmp.ne.s32.totalorder %s227_s1, %s118_s23  ;;  %p122_p4 = scmp.lt.u32.totalorder %s118_s23, %s227_s1 }
   0xd   :  { %p124_p5 = pnand %p122_p4, %p119_p3 }
   0xf   :  { %127 = shalt.err (!%p124_p5)
}
  0x10   :  { %s128_s28 = scalar_lea.vmem %s24_s20, 256  ;;  %p133_p7 = scmp.lt.s32.totalorder %s24_s20, %s24_s20 }
  0x11   :  { %p129_p6 = scmp.ne.s32.totalorder %s24_s20, %s128_s28  ;;  %p134_p8 = scmp.lt.s32.totalorder %s128_s28, %s128_s28 }
  0x13   :  { %p135_p9 = por %p134_p8, %p133_p7 }
  0x15   :  { %p136_p10 = pnand %p135_p9, %p129_p6 }
  0x17   :  { %139 = shalt.err (!%p136_p10)
}
  0x18   :  { %s170_s0 = smov 128   ;;  %s171_s29 = smov 8  }
  0x19   :  { %29 = dma.hbm_to_vmem [thread:$0]  %s227_s1, 256, %s24_s20, [#allocation3], %s170_s0, %s170_s0, %s171_s29  }
  0x1a   :  { %162 = dma.done.wait [#allocation5], 16  }
  0x1b   :  { %163 = vsyncadd [#allocation5], 4294967280 }
  0x1c   :  { %164 = dma.done.wait [#allocation3], 256  }
  0x1d   :  { %165 = vsyncadd [#allocation3], 4294967040 }
  0x1e   :  { %36 = sfence }
  0x1f   :  { %s37_s4 = sld [smem:[#allocation2]]  ;;  %s98_s5 = sld [smem:[#allocation2 + $0x1]]  ;;  %v38_v0 = vld [vmem:[#allocation6] ss:$4 sm:$0x3]  ;;  %v74_v17 = vlaneseq }
  0x20   :  { %s99_s6 = sld [smem:[#allocation2 + $0x2]]  ;;  %s100_s7 = sld [smem:[#allocation2 + $0x3]]  ;;  %v40_v1 = vld [vmem:[#allocation6 + $0x8] ss:$4 sm:$0x3] }
  0x21   :  { %v46_v2 = vld [vmem:[#allocation6 + $0x1] ss:$4 sm:$0x3]  ;;  %v48_v3 = vld [vmem:[#allocation6 + $0x9] ss:$4 sm:$0x3] }
  0x22   :  { %v56_v5 = vld [vmem:[#allocation6 + $0x2] ss:$4 sm:$0x3]  ;;  %v58_v6 = vld [vmem:[#allocation6 + $0xa] ss:$4 sm:$0x3] }
  0x23   :  { %v66_v9 = vld [vmem:[#allocation6 + $0x3] ss:$4 sm:$0x3]  ;;  %v68_v11 = vld [vmem:[#allocation6 + $0xb] ss:$4 sm:$0x3] }
  0x24   :  { %s172_s1 = smov [#allocation7]   ;;  %vm76_vm0 = vcmp.lt.s32.totalorder %v74_v17, 256 }
  0x25   :  { %v41_v4 = vstv %s37_s4  ;;  %v49_v8 = vstv %s98_s5  ;;  %s85_s8 = sshll.u32 %s172_s1, 4  ;;  %s86_s8 = int_to_ptr.vmem [resolvable:$true] %s85_s8 }
  0x26   :  { %v42_v7 = vmul.f32 %v41_v4, %v38_v0  ;;  %v43_v10 = vmul.f32 %v41_v4, %v40_v1  ;;  %v50_v12 = vmul.f32 %v49_v8, %v46_v2  ;;  %v59_v13 = vstv %s99_s6  ;;  %s140_s9 = scalar_lea.vmem %s86_s8, 64  ;;  %p145_p12 = scmp.lt.s32.totalorder %s86_s8, %s86_s8 }
  0x27   :  { %v51_v14 = vmul.f32 %v49_v8, %v48_v3  ;;  %v60_v15 = vmul.f32 %v59_v13, %v56_v5  ;;  %v69_v16 = vstv %s100_s7  ;;  %v61_v18 = vmul.f32 %v59_v13, %v58_v6  ;;  %p141_p11 = scmp.ne.s32.totalorder %s86_s8, %s140_s9  ;;  %p146_p13 = scmp.lt.s32.totalorder %s140_s9, %s140_s9 }
  0x28   :  { %v52_v19 = vadd.f32 %v50_v12, %v42_v7  ;;  %v70_v20 = vmul.f32 %v69_v16, %v66_v9  ;;  %v71_v22 = vmul.f32 %v69_v16, %v68_v11 }
  0x29   :  { %v53_v21 = vadd.f32 %v51_v14, %v43_v10  ;;  %p147_p0 = por %p146_p13, %p145_p12 }
  0x2a   :  { %v62_v23 = vadd.f32 %v60_v15, %v52_v19 }
  0x2b   :  { %v63_v24 = vadd.f32 %v61_v18, %v53_v21  ;;  %p148_p1 = pnand %p147_p0, %p141_p11 }
  0x2c   :  { %v72_v25 = vadd.f32 %v70_v20, %v62_v23 }
  0x2d   :  { %v73_v26 = vadd.f32 %v71_v22, %v63_v24 }
  0x2e   :  { %78 = vst.msk [vmem:[#allocation7] sm:$0x3] %vm76_vm0, %v72_v25 }
  0x2f   :  { %79 = vst.msk [vmem:[#allocation7 + $0x2] sm:$0x3] %vm76_vm0, %v73_v26 }
  0x30   :  { %151 = shalt.err (!%p148_p1)
}
  0x31   :  { %s152_s12 = scalar_lea.hbm %s228_s2, 64 }
  0x32   :  { %p153_p2 = scmp.ne.s32.totalorder %s228_s2, %s152_s12  ;;  %p156_p3 = scmp.lt.u32.totalorder %s152_s12, %s228_s2 }
  0x34   :  { %p158_p4 = pnand %p156_p3, %p153_p2 }
  0x36   :  { %161 = shalt.err (!%p158_p4)
}
  0x37   :  { %s173_s17 = smov 32   ;;  %s174_s18 = smov 2  }
  0x38   :  { %91 = dma.vmem_to_hbm [thread:$0]  %s86_s8, 64, %s228_s2, [#allocation4], %s173_s17, %s173_s17, %s174_s18  }
  0x39   :  { %166 = dma.done.wait [#allocation4], 64  }
  0x3a   :  { %167 = vsyncadd [#allocation4], 4294967232 }
  0x3b   :  { %95 = vsyncpa [#allocation3], 1 }
  0x3c   :  { %96 = vsyncpa [#allocation4], 1 }
  0x3d   :  { %97 = vsyncpa [#allocation5], 1 }

</bundles_post_ra>
